<compile_context>
chip_gen: v7x
topology: tpu7x:2x2x1
jax: 0.10.0
libtpu: 0.0.40
codegen_flags: <defaults>
</compile_context>

<pallas_src>
import functools
import math

import jax
import jax.numpy as jnp
from jax.experimental import pallas as pl
from jax.experimental.pallas import tpu as pltpu


# ---------------------------------------------------------------------------
# Kernels
# ---------------------------------------------------------------------------

def _rmsnorm_kernel(x_ref, w_ref, o_ref, *, eps):
    """Plain RMSNorm over the (full) last axis of the tile."""
    x = x_ref[...]
    xf = x.astype(jnp.float32)
    ms = jnp.mean(xf * xf, axis=-1, keepdims=True)   # XLU reduce
    inv = jax.lax.rsqrt(ms + eps)                     # EUP rsqrt
    # All scaling in f32; single cast at the end (matches the f32 reference
    # for bf16 inputs, bit-identical for f32 inputs).
    o_ref[...] = (xf * inv * w_ref[...]).astype(o_ref.dtype)


def _rmsnorm_folded_kernel(x_ref, w_ref, m_ref, o_ref, *, eps, inv_d):
    """Lane-dense RMSNorm: each VMEM row holds `fold` logical rows of width D.

    x_ref: (TILE_ROWS, F*D); w_ref: (1, F*D) f32 (weight tiled F times);
    m_ref: (F*D, F*D) f32 block-diagonal ones mask.

    The per-segment sum of squares is computed with a block-diagonal ones
    matmul on the otherwise-idle MXU; the result comes back already broadcast
    across each D-wide segment, so no lane-sparse intermediate or masked store
    is needed.  The redundant per-lane rsqrt lands on the EUP slot (free at
    this arithmetic intensity).
    """
    x = x_ref[...]
    xf = x.astype(jnp.float32)
    seg_sumsq = jnp.dot(xf * xf, m_ref[...],
                        preferred_element_type=jnp.float32,
                        precision=jax.lax.Precision.HIGHEST)
    inv = jax.lax.rsqrt(seg_sumsq * inv_d + eps)
    o_ref[...] = (xf * inv * w_ref[...]).astype(o_ref.dtype)


# ---------------------------------------------------------------------------
# Tiling helpers
# ---------------------------------------------------------------------------

def _vmem_capacity_bytes():
    try:
        return int(pltpu.get_tpu_info().vmem_capacity_bytes)
    except Exception:
        return 64 * 1024 * 1024   # v7x-safe default (smallest VMEM per TC)


def _fold_factor(d_model, max_folded_width=512):
    """Number of logical rows folded into one 128-lane-aligned VMEM row."""
    if d_model % 128 == 0:
        return 1                                   # already lane-dense
    f = 128 // math.gcd(d_model, 128)              # smallest F with F*D % 128 == 0
    if d_model * f > max_folded_width:             # keep the ones-mask tiny
        return 1
    return f


def _choose_tile_rows(rows, row_bytes, itemsize, io_budget):
    """Largest row tile such that double-buffered in+out tiles fit io_budget,
    is a multiple of the packed sublane count, and leaves >=2 grid steps when
    possible (so v7x's 2 TensorCores both get work)."""
    sublane = 8 if itemsize >= 4 else 16           # one bf16 vreg is [16, 128]
    max_rows = max(sublane, (io_budget // (4 * row_bytes)) // sublane * sublane)
    if rows <= 2 * sublane:
        return rows                                # single full-array block
    half = -(-rows // 2)                           # ceil(rows / 2)
    half = -(-half // sublane) * sublane           # round up to sublane multiple
    tile = min(max_rows, half)
    return max(sublane, (tile // sublane) * sublane)


# ---------------------------------------------------------------------------
# pallas_call wrapper
# ---------------------------------------------------------------------------

def _launch(kernel, x2d, extra_args, extra_specs, flops, transcendentals):
    rows, width = x2d.shape
    itemsize = jnp.dtype(x2d.dtype).itemsize
    row_bytes = width * itemsize

    vmem_cap = _vmem_capacity_bytes()
    # Double-buffered in+out tile budget: ~2 MiB input tiles on v7x (64 MiB
    # VMEM), ~4 MiB on v5e/v6e (128 MiB VMEM).
    io_budget = min(vmem_cap // 8, 16 * 1024 * 1024)
    tr = _choose_tile_rows(rows, row_bytes, itemsize, io_budget)
    grid = (pl.cdiv(rows, tr),)                    # ragged last block is masked

    in_out_bytes = 4 * tr * row_bytes              # 2 bufs x (in + out) tiles
    tmp_bytes = 6 * tr * width * 4                 # f32 compute temporaries
    const_bytes = sum(2 * int(a.size) * jnp.dtype(a.dtype).itemsize
                      for a in extra_args)
    vmem_limit = int(min(vmem_cap * 6 // 10,
                         max(16 * 1024 * 1024,
                             in_out_bytes + tmp_bytes + const_bytes
                             + 2 * 1024 * 1024)))

    cost = pl.CostEstimate(
        flops=int(flops),
        transcendentals=int(transcendentals),
        bytes_accessed=2 * rows * row_bytes + const_bytes // 2,
    )

    return pl.pallas_call(
        kernel,
        out_shape=jax.ShapeDtypeStruct((rows, width), x2d.dtype),
        grid_spec=pltpu.PrefetchScalarGridSpec(
            num_scalar_prefetch=0,
            grid=grid,
            in_specs=[pl.BlockSpec((tr, width), lambda i: (i, 0))] + extra_specs,
            out_specs=pl.BlockSpec((tr, width), lambda i: (i, 0)),
        ),
        compiler_params=pltpu.CompilerParams(
            dimension_semantics=("parallel",),
            vmem_limit_bytes=vmem_limit,
        ),
        cost_estimate=cost,
    )(x2d, *extra_args)


def rmsnorm(x, weight, eps=1e-5):
    """x: (..., d_model), weight: (d_model,). RMSNorm over the last axis."""
    orig_shape = x.shape
    d_model = orig_shape[-1]
    x2d = x.reshape(-1, d_model)
    rows = x2d.shape[0]

    fold = _fold_factor(d_model)
    if fold > 1 and rows % fold != 0:
        # TODO(synk): zero-pad the ragged rows instead of falling back to the
        # lane-sparse path (TFMamba's B*T*N is normally a multiple of `fold`).
        fold = 1

    if fold > 1:
        width = fold * d_model                     # multiple of 128 lanes
        xf2d = x2d.reshape(rows // fold, width)
        w = jnp.tile(weight.astype(jnp.float32), fold).reshape(1, width)
        mask = jnp.kron(jnp.eye(fold, dtype=jnp.float32),
                        jnp.ones((d_model, d_model), dtype=jnp.float32))
        kernel = functools.partial(_rmsnorm_folded_kernel, eps=float(eps),
                                   inv_d=1.0 / d_model)
        extra_specs = [
            pl.BlockSpec((1, width), lambda i: (0, 0)),       # weight (resident)
            pl.BlockSpec((width, width), lambda i: (0, 0)),   # ones mask (resident)
        ]
        rows_f = rows // fold
        out = _launch(kernel, xf2d, [w, mask], extra_specs,
                      flops=2 * rows_f * width * width + 5 * rows_f * width,
                      transcendentals=rows_f * width)
        return out.reshape(orig_shape)

    # Fallback / already lane-dense (d_model % 128 == 0) path.
    w = weight.astype(jnp.float32).reshape(1, d_model)
    kernel = functools.partial(_rmsnorm_kernel, eps=float(eps))
    extra_specs = [pl.BlockSpec((1, d_model), lambda i: (0, 0))]
    out = _launch(kernel, x2d, [w], extra_specs,
                  flops=5 * rows * d_model,
                  transcendentals=rows)
    return out.reshape(orig_shape)


def rmsnorm_ref(x, weight, eps=1e-5):
    xf = x.astype(jnp.float32)
    ms = jnp.mean(xf * xf, axis=-1, keepdims=True)
    return (xf * jax.lax.rsqrt(ms + eps) * weight.astype(jnp.float32)).astype(x.dtype)


if __name__ == "__main__":
    key = jax.random.PRNGKey(0)
    k1, k2, k3 = jax.random.split(key, 3)

    # Case 1: TFMamba-shaped (B, T, N, D), small. D=32 -> lane-dense folded
    # path with 4 logical rows per 128-lane VMEM row.
    B, T, N, D = 2, 8, 4, 32
    x = jax.random.normal(k1, (B, T, N, D), dtype=jnp.float32)
    w = jnp.ones((D,), dtype=jnp.float32)            # matches torch.ones init
    out = jax.block_until_ready(rmsnorm(x, w, eps=1e-5))
    ref = rmsnorm_ref(x, w, eps=1e-5)
    assert out.shape == x.shape
    assert jnp.allclose(out, ref, atol=1e-5, rtol=1e-5), "small-case mismatch"

    # Case 2: larger, multi-step grid with a ragged last block.
    # rows = 2*12*85 = 2040, D=96 -> fold=4, folded rows = 510, width = 384,
    # tile = 256 -> 2 grid steps (keeps both v7x TensorCores busy).
    x_big = jax.random.normal(k2, (2, 12, 85, 96), dtype=jnp.float32)
    w_big = jax.random.normal(k3, (96,), dtype=jnp.float32) * 0.1 + 1.0
    out_big = jax.block_until_ready(rmsnorm(x_big, w_big, eps=1e-5))
    ref_big = rmsnorm_ref(x_big, w_big, eps=1e-5)
    assert out_big.shape == x_big.shape
    assert jnp.allclose(out_big, ref_big, atol=1e-5, rtol=1e-5), "big-case mismatch"

    # Case 3: bf16 input — f32 compute inside the kernel, single final cast.
    x_bf = x_big.astype(jnp.bfloat16)
    out_bf = jax.block_until_ready(rmsnorm(x_bf, w_big, eps=1e-5))
    ref_bf = rmsnorm_ref(x_bf, w_big, eps=1e-5)
    assert out_bf.dtype == jnp.bfloat16
    assert jnp.allclose(out_bf.astype(jnp.float32), ref_bf.astype(jnp.float32),
                        atol=3e-2, rtol=3e-2), "bf16-case mismatch"

    # Case 4: row count not divisible by the fold factor -> plain fallback.
    x_odd = jax.random.normal(k1, (1, 3, 5, 32), dtype=jnp.float32)
    out_odd = jax.block_until_ready(rmsnorm(x_odd, w, eps=1e-5))
    ref_odd = rmsnorm_ref(x_odd, w, eps=1e-5)
    assert jnp.allclose(out_odd, ref_odd, atol=1e-5, rtol=1e-5), "fallback mismatch"

    print("KERNEL_OK")
</pallas_src>

<mosaic_0001>
module attributes {stable_mosaic.version = 11 : i64} {
  func.func @_rmsnorm_folded_kernel(%arg0: i32, %arg1: memref<16x128xf32, #tpu.memory_space<vmem>>, %arg2: memref<1x128xf32, #tpu.memory_space<vmem>>, %arg3: memref<128x128xf32, #tpu.memory_space<vmem>>, %arg4: memref<16x128xf32, #tpu.memory_space<vmem>>) attributes {dimension_semantics = [#tpu.dimension_semantics<parallel>], iteration_bounds = array<i64: 1>, scalar_prefetch = 0 : i64, scratch_operands = 0 : i64, tpu.core_type = #tpu.core_type<tc>, window_params = [{transform_indices = @transform_0, window_bounds = array<i64: 16, 128>}, {pipeline_mode = #tpu.pipeline_mode<synchronous>, transform_indices = @transform_1, window_bounds = array<i64: 1, 128>}, {pipeline_mode = #tpu.pipeline_mode<synchronous>, transform_indices = @transform_2, window_bounds = array<i64: 128, 128>}, {transform_indices = @transform_3, window_bounds = array<i64: 16, 128>}]} {
    %c0 = arith.constant 0 : index
    %c0_0 = arith.constant 0 : index
    %0 = vector.load %arg1[%c0, %c0_0] : memref<16x128xf32, #tpu.memory_space<vmem>>, vector<16x128xf32>
    %1 = arith.mulf %0, %0 : vector<16x128xf32>
    %c0_1 = arith.constant 0 : index
    %c0_2 = arith.constant 0 : index
    %2 = vector.load %arg3[%c0_1, %c0_2] : memref<128x128xf32, #tpu.memory_space<vmem>>, vector<128x128xf32>
    %cst = arith.constant dense<0.000000e+00> : vector<16x128xf32>
    %3 = tpu.matmul %1, %2, %cst {dimension_numbers = #tpu.dot_dimension_numbers<[1], [0], [0], [1], [0, 0, 1, 1], [], []>, precision = #tpu.contract_precision<fp32>} : vector<16x128xf32>, vector<128x128xf32>, vector<16x128xf32> -> vector<16x128xf32>
    %cst_3 = arith.constant 3.125000e-02 : f32
    %4 = vector.broadcast %cst_3 : f32 to vector<16x128xf32>
    %5 = arith.mulf %3, %4 : vector<16x128xf32>
    %cst_4 = arith.constant 9.99999974E-6 : f32
    %6 = vector.broadcast %cst_4 : f32 to vector<16x128xf32>
    %7 = arith.addf %5, %6 : vector<16x128xf32>
    %8 = math.rsqrt %7 : vector<16x128xf32>
    %9 = arith.mulf %0, %8 : vector<16x128xf32>
    %c0_5 = arith.constant 0 : index
    %c0_6 = arith.constant 0 : index
    %10 = vector.load %arg2[%c0_5, %c0_6] : memref<1x128xf32, #tpu.memory_space<vmem>>, vector<1x128xf32>
    %11 = vector.broadcast %10 : vector<1x128xf32> to vector<16x128xf32>
    %12 = arith.mulf %9, %11 : vector<16x128xf32>
    %c0_7 = arith.constant 0 : index
    %c0_8 = arith.constant 0 : index
    %13 = vector.load %arg4[%c0_7, %c0_8] : memref<16x128xf32, #tpu.memory_space<vmem>>, vector<16x128xf32>
    tpu.vector_store %arg4[%c0_7, %c0_8], %12 {strides = array<i32>} : memref<16x128xf32, #tpu.memory_space<vmem>>, vector<16x128xf32>,
    return
  }
  func.func @transform_0(%arg0: i32) -> (i32, i32) {
    %c0_i32 = arith.constant 0 : i32
    %c0_i32_0 = arith.constant 0 : i32
    return %arg0, %c0_i32 : i32, i32
  }
  func.func @transform_1(%arg0: i32) -> (i32, i32) {
    %c0_i32 = arith.constant 0 : i32
    %c0_i32_0 = arith.constant 0 : i32
    %c0_i32_1 = arith.constant 0 : i32
    return %c0_i32, %c0_i32_0 : i32, i32
  }
  func.func @transform_2(%arg0: i32) -> (i32, i32) {
    %c0_i32 = arith.constant 0 : i32
    %c0_i32_0 = arith.constant 0 : i32
    %c0_i32_1 = arith.constant 0 : i32
    return %c0_i32, %c0_i32_0 : i32, i32
  }
  func.func @transform_3(%arg0: i32) -> (i32, i32) {
    %c0_i32 = arith.constant 0 : i32
    %c0_i32_0 = arith.constant 0 : i32
    return %arg0, %c0_i32 : i32, i32
  }
}

</mosaic_0001>

<bundles_post_ra>
// kernel: tpu_custom_call.1
= control target key start
LH: loop header
LB: loop body
LE: loop exit
PB: predicated region body
PF: predicated region fallthrough
CT: control target
= control target key end

     0   :  { %8 = vsyncpa [#allocation3], 0  ;;  %s1731_s0 = inlined_call_operand.hbm [shape: f32[16,128], index: 0, kind: input, shape index: {}]   ;;  %s1732_s1 = inlined_call_operand.vmem [shape: f32[1,128], index: 1, kind: input, shape index: {}]   ;;  %s1733_s2 = inlined_call_operand.hbm [shape: f32[128,128], index: 2, kind: input, shape index: {}]   ;;  %s1734_s3 = inlined_call_operand.hbm [shape: f32[16,128], index: 3, kind: output, shape index: {}]  }
   0x1   :  { %9 = vsyncpa [#allocation6], 0 }
   0x2   :  { %10 = vsyncpa [#allocation4], 0  ;;  %s1386_s12 = smov [#allocation2]   ;;  %s1314_s16 = scalar_lea.hbm %s1731_s0, 256 }
   0x3   :  { %s16_s13 = sshll.u32 %s1386_s12, 4  ;;  %p1315_p0 = scmp.ne.s32.totalorder %s1731_s0, %s1314_s16  ;;  %s17_s13 = int_to_ptr.vmem [resolvable:$true] %s16_s13 }
   0x4   :  { %p1318_p1 = scmp.lt.u32.totalorder %s1314_s16, %s1731_s0 }
   0x6   :  { %p1320_p2 = pnand %p1318_p1, %p1315_p0 }
   0x8   :  { %1323 = shalt.err (!%p1320_p2)
}
   0x9   :  { %s1324_s21 = scalar_lea.vmem %s17_s13, 256  ;;  %p1329_p4 = scmp.lt.s32.totalorder %s17_s13, %s17_s13 }
   0xa   :  { %p1325_p3 = scmp.ne.s32.totalorder %s17_s13, %s1324_s21  ;;  %p1330_p5 = scmp.lt.s32.totalorder %s1324_s21, %s1324_s21 }
   0xc   :  { %p1331_p6 = por %p1330_p5, %p1329_p4 }
   0xe   :  { %p1332_p7 = pnand %p1331_p6, %p1325_p3 }
  0x10   :  { %1335 = shalt.err (!%p1332_p7)
}
  0x11   :  { %s1387_s22 = smov 128   ;;  %s1388_s23 = smov 8  }
  0x12   :  { %22 = dma.hbm_to_vmem [thread:$0]  %s1731_s0, 256, %s17_s13, [#allocation3], %s1387_s22, %s1387_s22, %s1388_s23  }
  0x13   :  { %s1389_s26 = smov [#allocation5]   ;;  %s1336_s30 = scalar_lea.hbm %s1733_s2, 2048 }
  0x14   :  { %s30_s27 = sshll.u32 %s1389_s26, 4  ;;  %p1337_p8 = scmp.ne.s32.totalorder %s1733_s2, %s1336_s30  ;;  %s31_s27 = int_to_ptr.vmem [resolvable:$true] %s30_s27 }
  0x15   :  { %p1340_p9 = scmp.lt.u32.totalorder %s1336_s30, %s1733_s2 }
  0x17   :  { %p1342_p10 = pnand %p1340_p9, %p1337_p8 }
  0x19   :  { %1345 = shalt.err (!%p1342_p10)
}
  0x1a   :  { %s1346_s8 = scalar_lea.vmem %s31_s27, 2048  ;;  %p1351_p12 = scmp.lt.s32.totalorder %s31_s27, %s31_s27 }
  0x1b   :  { %p1347_p11 = scmp.ne.s32.totalorder %s31_s27, %s1346_s8  ;;  %p1352_p13 = scmp.lt.s32.totalorder %s1346_s8, %s1346_s8 }
  0x1d   :  { %p1353_p0 = por %p1352_p13, %p1351_p12 }
  0x1f   :  { %p1354_p1 = pnand %p1353_p0, %p1347_p11 }
  0x21   :  { %1357 = shalt.err (!%p1354_p1)
}
  0x22   :  { %36 = dma.hbm_to_vmem [thread:$0]  %s1733_s2, 2048, %s31_s27, [#allocation6], %s1387_s22, %s1387_s22, %s1388_s23  }
  0x23   :  { %1380 = dma.done.wait [#allocation3], 256  }
  0x24   :  { %1381 = vsyncadd [#allocation3], 4294967040 }
  0x25   :  { %1382 = dma.done.wait [#allocation6], 2048  }
  0x26   :  { %1383 = vsyncadd [#allocation6], 4294965248  ;;  %v47_v0 = vld [vmem:[#allocation5] sm:$0xff]  ;;  %v48_v1 = vld [vmem:[#allocation5 + $0x8] sm:$0xff]  ;;  %s1390_s11 = smov [#allocation7]  }
  0x27   :  { %v49_v2 = vld [vmem:[#allocation5 + $0x10] sm:$0xff]  ;;  %v64_v3 = vand.u32 4294901760, %v47_v0  ;;  %v67_v4 = vand.u32 4294901760, %v48_v1  ;;  %v50_v5 = vld [vmem:[#allocation5 + $0x18] sm:$0xff]  ;;  %v1441_v7 = vld [vmem:[#allocation5 + $0x20] sm:$0xff]  ;;  %s771_s12 = sshll.u32 %s1390_s11, 4  ;;  %s772_s12 = int_to_ptr.vmem [resolvable:$true] %s771_s12 }
  0x28   :  { %v70_v6 = vand.u32 4294901760, %v49_v2  ;;  %v1443_v8 = vld [vmem:[#allocation5 + $0x28] sm:$0xff]  ;;  %v73_v9 = vand.u32 4294901760, %v50_v5  ;;  %v76_v11 = vand.u32 4294901760, %v1441_v7  ;;  %v1451_v14 = vld [vmem:[#allocation5 + $0x30] sm:$0xff]  ;;  %v1453_v15 = vld [vmem:[#allocation5 + $0x38] sm:$0xff]  ;;  %p1363_p3 = scmp.lt.s32.totalorder %s772_s12, %s772_s12 }
  0x29   :  { %v1445_v10 = vpack.c.bf16 %v67_v4, %v64_v3  ;;  %v79_v12 = vand.u32 4294901760, %v1443_v8  ;;  %v1457_v16 = vld [vmem:[#allocation2] sm:$0xff]  ;;  %v82_v19 = vand.u32 4294901760, %v1451_v14  ;;  %v85_v20 = vand.u32 4294901760, %v1453_v15  ;;  %v1473_v21 = vld [vmem:[#allocation5 + $0x40] sm:$0xff]  ;;  %v1475_v22 = vld [vmem:[#allocation5 + $0x48] sm:$0xff] }
  0x2a   :  { %v1449_v13 = vpack.c.bf16 %v73_v9, %v70_v6  ;;  %v45_v17 = vmul.f32 %v1457_v16, %v1457_v16  ;;  %v1484_v25 = vld [vmem:[#allocation2 + $0x8] sm:$0xff]  ;;  %v88_v27 = vand.u32 4294901760, %v1473_v21  ;;  %v91_v28 = vand.u32 4294901760, %v1475_v22  ;;  %v1496_v29 = vld [vmem:[#allocation5 + $0x50] sm:$0xff]  ;;  %v1520_v39 = vld [vmem:[#allocation5 + $0x60] sm:$0xff]  ;;  %s1358_s13 = scalar_lea.vmem %s772_s12, 256 }
  0x2b   :  { %1104 = vmatprep.subr.bf16.mxu1 %v1445_v10  ;;  %1200 = vmatprep.subr.bf16.mxu0 %v1445_v10  ;;  %v1469_v18 = vpack.c.bf16 %v79_v12, %v76_v11  ;;  %v1492_v26 = vpack.c.bf16 %v85_v20, %v82_v19  ;;  %v1498_v30 = vld [vmem:[#allocation5 + $0x58] sm:$0xff]  ;;  %v46_v32 = vmul.f32 %v1484_v25, %v1484_v25  ;;  %v94_v36 = vand.u32 4294901760, %v1496_v29  ;;  %v1522_v40 = vld [vmem:[#allocation5 + $0x68] sm:$0xff]  ;;  %v1528_v43 = vld [vmem:[#allocation5 + $0x70] sm:$0xff]  ;;  %p1359_p2 = scmp.ne.s32.totalorder %s772_s12, %s1358_s13  ;;  %p1364_p4 = scmp.lt.s32.totalorder %s1358_s13, %s1358_s13 }
  0x2c   :  { %1106 = vmatpush3.bf16.msra.mxu1 %v1445_v10  ;;  %1202 = vmatpush3.bf16.msra.mxu0 %v1445_v10  ;;  %v1477_v23 = vand.u32 4294901760, %v45_v17  ;;  %v1506_v34 = vsub.f32 %v47_v0, %v64_v3  ;;  %v1514_v35 = vpack.c.bf16 %v91_v28, %v88_v27  ;;  %v97_v37 = vand.u32 4294901760, %v1498_v30  ;;  %v1545_v50 = vld [vmem:[#allocation5 + $0x78] sm:$0xff] }
  0x2d   :  { %1108 = vmatprep.subr.bf16.mxu1 %v1449_v13  ;;  %1204 = vmatprep.subr.bf16.mxu0 %v1449_v13  ;;  %v1518_v38 = vsub.f32 %v48_v1, %v67_v4  ;;  %v1524_v42 = vand.u32 4294901760, %v46_v32  ;;  %v1531_v45 = vsub.f32 %v49_v2, %v70_v6  ;;  %v1533_v46 = vsub.f32 %v50_v5, %v73_v9  ;;  %p1365_p5 = por %p1364_p4, %p1363_p3 }
  0x2e   :  { %v1482_v24 = vsub.f32 %v45_v17, %v1477_v23  ;;  %v167_v44 = vand.u32 4294901760, %v1506_v34  ;;  %v1541_v47 = vpack.c.bf16 %v97_v37, %v94_v36  ;;  %v100_v48 = vand.u32 4294901760, %v1520_v39 }
  0x2f   :  { %v103_v49 = vand.u32 4294901760, %v1522_v40  ;;  %v174_v51 = vand.u32 4294901760, %v1518_v38  ;;  %v106_v52 = vand.u32 4294901760, %v1528_v43  ;;  %v1550_v53 = vsub.f32 %v46_v32, %v1524_v42  ;;  %p1366_p6 = pnand %p1365_p5, %p1359_p2 }
  0x30   :  { %1110 = vmatpush3.bf16.msra.mxu1 %v1449_v13  ;;  %1206 = vmatpush3.bf16.msra.mxu0 %v1449_v13  ;;  %v146_v31 = vand.u32 4294901760, %v1482_v24  ;;  %v1555_v54 = vsub.f32 %v1441_v7, %v76_v11  ;;  %v109_v55 = vand.u32 4294901760, %v1545_v50  ;;  %v168_v56 = vsub.f32 %v1506_v34, %v167_v44 }
  0x31   :  { %1112 = vmatprep.subr.bf16.mxu1 %v1469_v18  ;;  %1208 = vmatprep.subr.bf16.mxu0 %v1469_v18  ;;  %v181_v57 = vand.u32 4294901760, %v1531_v45  ;;  %v188_v58 = vand.u32 4294901760, %v1533_v46  ;;  %v1569_v59 = vpack.c.bf16 %v103_v49, %v100_v48  ;;  %v175_v60 = vsub.f32 %v1518_v38, %v174_v51 }
  0x32   :  { %v147_v33 = vsub.f32 %v1482_v24, %v146_v31  ;;  %1030 = vmatprep.mubr.f32.mxu0 %v146_v31  ;;  %v1575_v61 = vsub.f32 %v1443_v8, %v79_v12  ;;  %v156_v62 = vand.u32 4294901760, %v1550_v53  ;;  %v195_v63 = vand.u32 4294901760, %v1555_v54 }
  0x33   :  { %v1585_v0 = vpack.c.bf16 %v109_v55, %v106_v52  ;;  %v169_v1 = vand.u32 4294901760, %v168_v56  ;;  %v182_v2 = vsub.f32 %v1531_v45, %v181_v57  ;;  %v189_v3 = vsub.f32 %v1533_v46, %v188_v58 }
  0x34   :  { %1114 = vmatpush3.bf16.msra.mxu1 %v1469_v18  ;;  %1210 = vmatpush3.bf16.msra.mxu0 %v1469_v18  ;;  %v148_v41 = vand.u32 4294901760, %v147_v33  ;;  %v176_v4 = vand.u32 4294901760, %v175_v60  ;;  %v202_v5 = vand.u32 4294901760, %v1575_v61  ;;  %v1595_v6 = vsub.f32 %v1451_v14, %v82_v19 }
  0x35   :  { %1116 = vmatprep.subr.bf16.mxu1 %v1492_v26  ;;  %1212 = vmatprep.subr.bf16.mxu0 %v1492_v26  ;;  %v1600_v7 = vsub.f32 %v1453_v15, %v85_v20  ;;  %v1231_v8 = vpack.c.bf16 %v174_v51, %v167_v44  ;;  %v157_v9 = vsub.f32 %v1550_v53, %v156_v62  ;;  %v183_v12 = vand.u32 4294901760, %v182_v2 }
  0x36   :  { %925 = vmatprep.mubr.f32.mxu1 %v148_v41  ;;  %v196_v11 = vsub.f32 %v1555_v54, %v195_v63  ;;  %v190_v17 = vand.u32 4294901760, %v189_v3  ;;  %v1609_v14 = vsub.f32 %v1473_v21, %v88_v27  ;;  %v1614_v15 = vsub.f32 %v1475_v22, %v91_v28 }
  0x37   :  { %v1135_v19 = vpack.c.bf16 %v176_v4, %v169_v1  ;;  %v203_v20 = vsub.f32 %v1575_v61, %v202_v5  ;;  %v209_v31 = vand.u32 4294901760, %v1595_v6  ;;  %v216_v32 = vand.u32 4294901760, %v1600_v7 }
  0x38   :  { %1118 = vmatpush3.bf16.msra.mxu1 %v1492_v26  ;;  %1214 = vmatpush3.bf16.msra.mxu0 %v1492_v26  ;;  %v158_v33 = vand.u32 4294901760, %v157_v9  ;;  %v1235_v41 = vpack.c.bf16 %v188_v58, %v181_v57  ;;  %v197_v21 = vand.u32 4294901760, %v196_v11  ;;  %v223_v22 = vand.u32 4294901760, %v1609_v14 }
  0x39   :  { %1120 = vmatprep.subr.bf16.mxu1 %v1514_v35  ;;  %1216 = vmatprep.subr.bf16.mxu0 %v1514_v35  ;;  %v230_v27 = vand.u32 4294901760, %v1614_v15  ;;  %v1628_v28 = vsub.f32 %v1496_v29, %v94_v36  ;;  %v1633_v44 = vsub.f32 %v1498_v30, %v97_v37  ;;  %v1139_v51 = vpack.c.bf16 %v190_v17, %v183_v12 }
  0x3a   :  { %v204_v56 = vand.u32 4294901760, %v203_v20  ;;  %v210_v57 = vsub.f32 %v1595_v6, %v209_v31  ;;  %v217_v58 = vsub.f32 %v1600_v7, %v216_v32  ;;  %v1239_v60 = vpack.c.bf16 %v202_v5, %v195_v63 }
  0x3b   :  { %v1640_v29 = vsub.f32 %v1520_v39, %v100_v48  ;;  %v224_v30 = vsub.f32 %v1609_v14, %v223_v22  ;;  %v231_v36 = vsub.f32 %v1614_v15, %v230_v27  ;;  %v237_v37 = vand.u32 4294901760, %v1628_v28 }
  0x3c   :  { %1122 = vmatpush3.bf16.msra.mxu1 %v1514_v35  ;;  %1218 = vmatpush3.bf16.msra.mxu0 %v1514_v35  ;;  %v244_v1 = vand.u32 4294901760, %v1633_v44  ;;  %v1143_v2 = vpack.c.bf16 %v204_v56, %v197_v21  ;;  %v218_v63 = vand.u32 4294901760, %v217_v58  ;;  %v1649_v39 = vsub.f32 %v1522_v40, %v103_v49 }
  0x3d   :  { %1124 = vmatprep.subr.bf16.mxu1 %v1541_v47  ;;  %1220 = vmatprep.subr.bf16.mxu0 %v1541_v47  ;;  %v1243_v48 = vpack.c.bf16 %v216_v32, %v209_v31  ;;  %v251_v3 = vand.u32 4294901760, %v1640_v29  ;;  %v225_v4 = vand.u32 4294901760, %v224_v30  ;;  %v232_v5 = vand.u32 4294901760, %v231_v36 }
  0x3e   :  { %v245_v9 = vsub.f32 %v1633_v44, %v244_v1  ;;  %v258_v40 = vand.u32 4294901760, %v1649_v39  ;;  %v1660_v49 = vsub.f32 %v1528_v43, %v106_v52  ;;  %v1665_v12 = vsub.f32 %v1545_v50, %v109_v55 }
  0x3f   :  { %v1247_v17 = vpack.c.bf16 %v230_v27, %v223_v22  ;;  %v252_v31 = vsub.f32 %v1640_v29, %v251_v3  ;;  %v1151_v32 = vpack.c.bf16 %v232_v5, %v225_v4  ;;  %v1251_v50 = vpack.c.bf16 %v244_v1, %v237_v37 }
  0x40   :  { %1126 = vmatpush3.bf16.msra.mxu1 %v1541_v47  ;;  %1222 = vmatpush3.bf16.msra.mxu0 %v1541_v47  ;;  %v246_v20 = vand.u32 4294901760, %v245_v9  ;;  %v265_v43 = vand.u32 4294901760, %v1660_v49  ;;  %v272_v52 = vand.u32 4294901760, %v1665_v12  ;;  %v1255_v56 = vpack.c.bf16 %v258_v40, %v251_v3 }
  0x41   :  { %1128 = vmatprep.subr.bf16.mxu1 %v1569_v59  ;;  %1224 = vmatprep.subr.bf16.mxu0 %v1569_v59  ;;  %v253_v55 = vand.u32 4294901760, %v252_v31  ;;  %v1167_v36 = vpack.c.bf16 %v1518_v38, %v1506_v34  ;;  %v1175_v34 = vpack.c.bf16 %v1575_v61, %v1555_v54  ;;  %v1179_v38 = vpack.c.bf16 %v1600_v7, %v1595_v6 }
  0x42   :  { %v266_v22 = vsub.f32 %v1660_v49, %v265_v43  ;;  %v273_v27 = vsub.f32 %v1665_v12, %v272_v52  ;;  %v1259_v30 = vpack.c.bf16 %v272_v52, %v265_v43 }
  0x44   :  { %1130 = vmatpush3.bf16.msra.mxu1 %v1569_v59  ;;  %1226 = vmatpush3.bf16.msra.mxu0 %v1569_v59  ;;  %v274_v58 = vand.u32 4294901760, %v273_v27 }
  0x45   :  { %1132 = vmatprep.subr.bf16.mxu1 %v1585_v0  ;;  %1228 = vmatprep.subr.bf16.mxu0 %v1585_v0 }
  0x48   :  { %1134 = vmatpush3.bf16.msra.mxu1 %v1585_v0  ;;  %1230 = vmatpush3.bf16.msra.mxu0 %v1585_v0 }
  0x49   :  { %1136 = vmatprep.subr.bf16.mxu1 %v1135_v19  ;;  %1232 = vmatprep.subr.bf16.mxu0 %v1231_v8 }
  0x4b   :  { %926 = vmatmul.mubr.f32.vlgmr.msra.gmra.mrb[0].mxu1 %v158_v33  ;;  %1031 = vmatmul.mubr.f32.vlgmr.msra.gmra.mrb[0].mxu0 %v156_v62  ;;  %v211_v62 = vand.u32 4294901760, %v210_v57  ;;  %v259_v33 = vsub.f32 %v1649_v39, %v258_v40  ;;  %v267_v57 = vand.u32 4294901760, %v266_v22 }
  0x4c   :  { %1138 = vmatpush3.bf16.msra.mxu1 %v1135_v19  ;;  %1234 = vmatpush3.bf16.msra.mxu0 %v1231_v8  ;;  %v238_v8 = vsub.f32 %v1628_v28, %v237_v37  ;;  %v1171_v37 = vpack.c.bf16 %v1533_v46, %v1531_v45 }
  0x4d   :  { %1140 = vmatprep.subr.bf16.mxu1 %v1139_v51  ;;  %1236 = vmatprep.subr.bf16.mxu0 %v1235_v41  ;;  %v1147_v11 = vpack.c.bf16 %v218_v63, %v211_v62  ;;  %v260_v21 = vand.u32 4294901760, %v259_v33 }
  0x4e   :  { %960 = vmatprep.mubr.f32.mxu1 %v1477_v23  ;;  %1065 = vmatprep.mubr.f32.mxu0 %v1477_v23  ;;  %v239_v19 = vand.u32 4294901760, %v238_v8 }
  0x50   :  { %1142 = vmatpush3.bf16.msra.mxu1 %v1139_v51  ;;  %1238 = vmatpush3.bf16.msra.mxu0 %v1235_v41  ;;  %v1155_v41 = vpack.c.bf16 %v246_v20, %v239_v19  ;;  %v1159_v51 = vpack.c.bf16 %v260_v21, %v253_v55 }
  0x51   :  { %1144 = vmatprep.subr.bf16.mxu1 %v1143_v2  ;;  %1240 = vmatprep.subr.bf16.mxu0 %v1239_v60 }
  0x54   :  { %1146 = vmatpush3.bf16.msra.mxu1 %v1143_v2  ;;  %1242 = vmatpush3.bf16.msra.mxu0 %v1239_v60  ;;  %v1163_v60 = vpack.c.bf16 %v274_v58, %v267_v57 }
  0x55   :  { %1148 = vmatprep.subr.bf16.mxu1 %v1147_v11  ;;  %1244 = vmatprep.subr.bf16.mxu0 %v1243_v48 }
  0x58   :  { %1150 = vmatpush3.bf16.msra.mxu1 %v1147_v11  ;;  %1246 = vmatpush3.bf16.msra.mxu0 %v1243_v48 }
  0x59   :  { %1152 = vmatprep.subr.bf16.mxu1 %v1151_v32  ;;  %1248 = vmatprep.subr.bf16.mxu0 %v1247_v17 }
  0x5c   :  { %1154 = vmatpush3.bf16.msra.mxu1 %v1151_v32  ;;  %1250 = vmatpush3.bf16.msra.mxu0 %v1247_v17 }
  0x5d   :  { %1156 = vmatprep.subr.bf16.mxu1 %v1155_v41  ;;  %1252 = vmatprep.subr.bf16.mxu0 %v1251_v50 }
  0x60   :  { %1158 = vmatpush3.bf16.msra.mxu1 %v1155_v41  ;;  %1254 = vmatpush3.bf16.msra.mxu0 %v1251_v50 }
  0x61   :  { %1160 = vmatprep.subr.bf16.mxu1 %v1159_v51  ;;  %1256 = vmatprep.subr.bf16.mxu0 %v1255_v56 }
  0x64   :  { %1162 = vmatpush3.bf16.msra.mxu1 %v1159_v51  ;;  %1258 = vmatpush3.bf16.msra.mxu0 %v1255_v56 }
  0x65   :  { %1164 = vmatprep.subr.bf16.mxu1 %v1163_v60  ;;  %1260 = vmatprep.subr.bf16.mxu0 %v1259_v30 }
  0x68   :  { %1166 = vmatpush3.bf16.msra.mxu1 %v1163_v60  ;;  %1262 = vmatpush3.bf16.msra.mxu0 %v1259_v30 }
  0x69   :  { %1168 = vmatprep.subr.bf16.mxu1 %v1167_v36  ;;  %1264 = vmatprep.subr.bf16.mxu0 %v1445_v10 }
  0x6b   :  { %961 = vmatmul.mubr.f32.vlgmr.msra.gmra.mrb[0].mxu1 %v1524_v42  ;;  %1066 = vmatmul.mubr.f32.vlgmr.msra.gmra.mrb[0].mxu0 %v1524_v42 }
  0x6c   :  { %1170 = vmatpush3.bf16.msra.mxu1 %v1167_v36  ;;  %1266 = vmatpush3.bf16.msra.mxu0 %v1445_v10  ;;  %v1183_v10 = vpack.c.bf16 %v1614_v15, %v1609_v14 }
  0x6d   :  { %1172 = vmatprep.subr.bf16.mxu1 %v1171_v37  ;;  %1268 = vmatprep.subr.bf16.mxu0 %v1449_v13 }
  0x6e   :  { %995 = vmatprep.mubr.f32.mxu1 %v1482_v24  ;;  %1100 = vmatprep.mubr.f32.mxu0 %v1477_v23  ;;  %v1195_v23 = vpack.c.bf16 %v1665_v12, %v1660_v49 }
  0x70   :  { %1174 = vmatpush3.bf16.msra.mxu1 %v1171_v37  ;;  %1270 = vmatpush3.bf16.msra.mxu0 %v1449_v13  ;;  %v1187_v13 = vpack.c.bf16 %v1633_v44, %v1628_v28 }
  0x71   :  { %1176 = vmatprep.subr.bf16.mxu1 %v1175_v34  ;;  %1272 = vmatprep.subr.bf16.mxu0 %v1469_v18 }
  0x74   :  { %1178 = vmatpush3.bf16.msra.mxu1 %v1175_v34  ;;  %1274 = vmatpush3.bf16.msra.mxu0 %v1469_v18  ;;  %v1191_v18 = vpack.c.bf16 %v1649_v39, %v1640_v29 }
  0x75   :  { %1180 = vmatprep.subr.bf16.mxu1 %v1179_v38  ;;  %1276 = vmatprep.subr.bf16.mxu0 %v1492_v26 }
  0x78   :  { %1182 = vmatpush3.bf16.msra.mxu1 %v1179_v38  ;;  %1278 = vmatpush3.bf16.msra.mxu0 %v1492_v26 }
  0x79   :  { %1184 = vmatprep.subr.bf16.mxu1 %v1183_v10  ;;  %1280 = vmatprep.subr.bf16.mxu0 %v1514_v35 }
  0x7c   :  { %1186 = vmatpush3.bf16.msra.mxu1 %v1183_v10  ;;  %1282 = vmatpush3.bf16.msra.mxu0 %v1514_v35 }
  0x7d   :  { %1188 = vmatprep.subr.bf16.mxu1 %v1187_v13  ;;  %1284 = vmatprep.subr.bf16.mxu0 %v1541_v47 }
  0x80   :  { %1190 = vmatpush3.bf16.msra.mxu1 %v1187_v13  ;;  %1286 = vmatpush3.bf16.msra.mxu0 %v1541_v47 }
  0x81   :  { %1192 = vmatprep.subr.bf16.mxu1 %v1191_v18  ;;  %1288 = vmatprep.subr.bf16.mxu0 %v1569_v59 }
  0x84   :  { %1194 = vmatpush3.bf16.msra.mxu1 %v1191_v18  ;;  %1290 = vmatpush3.bf16.msra.mxu0 %v1569_v59 }
  0x85   :  { %1196 = vmatprep.subr.bf16.mxu1 %v1195_v23  ;;  %1292 = vmatprep.subr.bf16.mxu0 %v1585_v0 }
  0x88   :  { %1198 = vmatpush3.bf16.msra.mxu1 %v1195_v23  ;;  %1294 = vmatpush3.bf16.msra.mxu0 %v1585_v0  ;;  %v784_v0 = vld [vmem:[%s1732_s1] ss:$0 sm:$0xff] }
  0x8b   :  { %996 = vmatmul.mubr.f32.vlgmr.msra.gmra.mrb[0].mxu1 %v1550_v53  ;;  %1101 = vmatmul.mubr.f32.vlgmr.msra.gmra.mrb[0].mxu0 %v1524_v42 }
 0x15e   :  { %v997_v24 = vpop.f32.mrb[0].mxu1  ;;  %v1102_v26 = vpop.f32.mrb[0].mxu0 }
 0x15f   :  { %v1295_v35 = vadd.f32 %v1102_v26, %v997_v24  ;;  %v421_v45 = vpop.f32.mrb[1].mxu1  ;;  %v737_v46 = vpop.f32.mrb[1].mxu0 }
 0x160   :  { %v1296_v47 = vadd.f32 %v737_v46, %v421_v45 }
 0x161   :  { %v748_v54 = vmul.f32 0.03125, %v1295_v35 }
 0x162   :  { %v747_v61 = vmul.f32 0.03125, %v1296_v47 }
 0x163   :  { %v750_v6 = vadd.f32 1e-05, %v748_v54 }
 0x164   :  { %v749_v59 = vadd.f32 1e-05, %v747_v61 }
 0x165   :  { %1310 = vrsqrt.f32 %v750_v6 }
 0x166   :  { %1312 = vrsqrt.f32 %v749_v59 }
 0x16f   :  { %v1311_v7 = vpop.eup %1310 }
 0x170   :  { %v1313_v53 = vpop.eup %1312  ;;  %v754_v42 = vmul.f32 %v1311_v7, %v1484_v25 }
 0x171   :  { %v753_v14 = vmul.f32 %v1313_v53, %v1457_v16 }
 0x172   :  { %v763_v15 = vmul.f32 %v784_v0, %v754_v42 }
 0x173   :  { %v762_v28 = vmul.f32 %v784_v0, %v753_v14 }
 0x174   :  { %765 = vst [vmem:[#allocation7 + $0x8] sm:$0xff] %v763_v15 }
 0x175   :  { %764 = vst [vmem:[#allocation7] sm:$0xff] %v762_v28 }
 0x176   :  { %1369 = shalt.err (!%p1366_p6)
}
 0x177   :  { %s1370_s15 = scalar_lea.hbm %s1734_s3, 256 }
 0x178   :  { %p1371_p7 = scmp.ne.s32.totalorder %s1734_s3, %s1370_s15  ;;  %p1374_p8 = scmp.lt.u32.totalorder %s1370_s15, %s1734_s3 }
 0x17a   :  { %p1376_p9 = pnand %p1374_p8, %p1371_p7 }
 0x17c   :  { %1379 = shalt.err (!%p1376_p9)
}
 0x17d   :  { %777 = dma.vmem_to_hbm [thread:$0]  %s772_s12, 256, %s1734_s3, [#allocation4], %s1387_s22, %s1387_s22, %s1388_s23  }
 0x17e   :  { %1384 = dma.done.wait [#allocation4], 256  }
 0x17f   :  { %1385 = vsyncadd [#allocation4], 4294967040 }
 0x180   :  { %781 = vsyncpa [#allocation3], 1 }
 0x181   :  { %782 = vsyncpa [#allocation6], 1 }
 0x182   :  { %783 = vsyncpa [#allocation4], 1 }

</bundles_post_ra>
